<compile_context>
chip_gen: v7x
topology: tpu7x:2x2x1
jax: 0.10.0
libtpu: 0.0.40
codegen_flags: <defaults>
</compile_context>

<pallas_src>
import functools

import jax
import jax.numpy as jnp
from jax import lax
from jax.experimental import pallas as pl
from jax.experimental.pallas import tpu as pltpu


# ----------------------------------------------------------------------------
# Generation-aware VMEM budget
# ----------------------------------------------------------------------------
@functools.lru_cache(maxsize=None)
def _vmem_params():
    """Return (working-set budget bytes, vmem_limit_bytes) for this TPU gen."""
    cap = None
    try:
        cap = getattr(pltpu.get_tpu_info(), "vmem_capacity_bytes", None)
    except Exception:  # interpret mode / very old runtimes
        cap = None
    if cap is None:
        cap = 64 << 20                     # assume smallest (v7x per-TC VMEM)
    if cap >= (96 << 20):                  # v5e / v6e: 128 MiB physical VMEM
        return 48 << 20, 96 << 20
    return 16 << 20, 32 << 20              # v7x: 64 MiB per TC -> stay lean


# ----------------------------------------------------------------------------
# Tile selection
# ----------------------------------------------------------------------------
def _auto_tiles(n, c, hw, logit_itemsize, budget):
    """Pick (batch rows per step, HW lanes per step, #hw tiles)."""
    c_pad = -(-c // 8) * 8
    # Rough VMEM bytes per (batch-row, lane):
    #   2x double-buffered logits tile  : 2 * c_pad * itemsize
    #   2x double-buffered int8 targets : ~8 (packed, generous)
    #   live f32 temporaries in the body: ~6 full (c_pad) columns
    bytes_per_lane_row = 2 * c_pad * logit_itemsize + 8 + 24 * c_pad
    max_lanes = max(128, budget // bytes_per_lane_row)
    if hw <= max_lanes:
        t = hw                              # whole spatial dim (always legal)
    else:
        t = (min(max_lanes, 32768) // 128) * 128
    n_hw = -(-hw // t)

    bn_max = max(1, budget // (bytes_per_lane_row * t))
    if n >= 2:
        # Keep >= 2 steps on the "parallel" batch axis so both v7x TensorCores
        # get sharded work (the HW axis is the reduction axis).
        bn_max = min(bn_max, n // 2)
    bn = 1
    for d in range(min(n, max(bn_max, 1)), 0, -1):
        if n % d == 0:
            bn = d
            break
    # Keep >= ~4 grid steps when there is enough work so the pipeline can
    # overlap DMA with the exp/reduce compute.
    while bn > 1 and (n // bn) * n_hw < 4:
        bn -= 1
        while n % bn:
            bn -= 1
    return bn, t, n_hw


def _resolve_tiles(n, c, hw, logit_itemsize, batch_tile, hw_tile, budget):
    bn, t, _ = _auto_tiles(n, c, hw, logit_itemsize, budget)
    if hw_tile is not None:
        t = min(int(hw_tile), hw)
        assert t == hw or t % 128 == 0, \
            "hw_tile must equal H*W or be a multiple of 128"
    if batch_tile is not None:
        bn = int(batch_tile)
        assert n % bn == 0, "batch_tile must divide the batch size"
    n_hw = -(-hw // t)
    return bn, t, n_hw


# ----------------------------------------------------------------------------
# Fused partial-sum kernel (Dice intersection/union + CE negative log-lik)
# ----------------------------------------------------------------------------
def _partials_kernel(logits_ref, tgt_ref, *out_refs, hw, t, n_hw, needs_mask,
                     compute_dice, compute_ce):
    if compute_dice and compute_ce:
        inter_ref, union_ref, nll_ref = out_refs
    elif compute_dice:
        inter_ref, union_ref = out_refs
        nll_ref = None
    else:
        (nll_ref,) = out_refs
        inter_ref = union_ref = None

    j = pl.program_id(1)                                  # HW-tile (reduction) index

    @pl.when(j == 0)
    def _():                                              # init resident accumulators
        for ref in out_refs:
            ref[...] = jnp.zeros_like(ref)

    # Single streaming softmax pass shared by both losses.  Logits arrive in
    # their native dtype (bf16 stays bf16 over HBM) and are cast here.
    x = logits_ref[...].astype(jnp.float32)              # (Bn, C, T)
    m = jnp.max(x, axis=1, keepdims=True)                 # (Bn, 1, T)
    e = jnp.exp(x - m)
    z = jnp.sum(e, axis=1, keepdims=True)                  # (Bn, 1, T)

    tgt = tgt_ref[...].astype(jnp.int32)                   # int8 DMA -> int32 compare
    cls = lax.broadcasted_iota(jnp.int32, x.shape, 1)       # class ids on sublanes
    onehot = tgt == cls                                     # bool, no float one-hot DMA

    p = onehot_f = nll = None
    if compute_dice:
        p = e * pl.reciprocal(z, approx=False)              # exact: z is only (Bn,1,T)
        onehot_f = jnp.where(onehot, 1.0, 0.0)
    if compute_ce:
        x_t = jnp.sum(jnp.where(onehot, x, 0.0), axis=1, keepdims=True)
        nll = jnp.log(z) + m - x_t                          # -log softmax[target]

    def accumulate(p_, oh_, nll_):
        if compute_dice:
            inter_ref[...] += jnp.sum(p_ * oh_, axis=2, keepdims=True)
            union_ref[...] += jnp.sum(p_ + oh_, axis=2, keepdims=True)  # fused union
        if compute_ce:
            nll_ref[...] += jnp.sum(nll_, axis=2, keepdims=True)

    if not needs_mask:
        accumulate(p, onehot_f, nll)
    else:
        # Unmasked fast path for every HW tile but the ragged tail tile ...
        @pl.when(j != n_hw - 1)
        def _():
            accumulate(p, onehot_f, nll)

        # ... and a select-masked path for the tail tile only (padded lanes may
        # hold NaN/Inf; select discards them without propagation).
        @pl.when(j == n_hw - 1)
        def _():
            lane = lax.broadcasted_iota(jnp.int32, (1, 1, t), 2)
            valid = (j * t + lane) < hw
            p_m = jnp.where(valid, p, 0.0) if compute_dice else None
            oh_m = jnp.where(valid, onehot_f, 0.0) if compute_dice else None
            nll_m = jnp.where(valid, nll, 0.0) if compute_ce else None
            accumulate(p_m, oh_m, nll_m)


# ----------------------------------------------------------------------------
# Pallas-backed partial sums + loss wrappers
# ----------------------------------------------------------------------------
def _partial_sums(output, target, *, compute_dice, compute_ce,
                  batch_tile=None, hw_tile=None):
    assert compute_dice or compute_ce
    n, c, h, w = output.shape
    hw = h * w
    assert c <= 127, "int8 target path requires fewer than 128 classes"
    logits = output.reshape(n, c, hw)                      # native dtype, no upcast
    tgt = target.reshape(n, 1, hw).astype(jnp.int8)        # 4x fewer target HBM bytes
    budget, vmem_limit = _vmem_params()
    bn, t, n_hw = _resolve_tiles(n, c, hw, jnp.dtype(output.dtype).itemsize,
                                 batch_tile, hw_tile, budget)
    needs_mask = (hw % t) != 0

    out_shape, out_specs = [], []
    if compute_dice:
        out_shape += [jax.ShapeDtypeStruct((n, c, 1), jnp.float32),
                      jax.ShapeDtypeStruct((n, c, 1), jnp.float32)]
        out_specs += [pl.BlockSpec((bn, c, 1), lambda i, j: (i, 0, 0)),
                      pl.BlockSpec((bn, c, 1), lambda i, j: (i, 0, 0))]
    if compute_ce:
        out_shape += [jax.ShapeDtypeStruct((n, 1, 1), jnp.float32)]
        out_specs += [pl.BlockSpec((bn, 1, 1), lambda i, j: (i, 0, 0))]

    kernel = functools.partial(_partials_kernel, hw=hw, t=t, n_hw=n_hw,
                               needs_mask=needs_mask,
                               compute_dice=compute_dice, compute_ce=compute_ce)
    outs = pl.pallas_call(
        kernel,
        out_shape=tuple(out_shape),
        grid_spec=pltpu.PrefetchScalarGridSpec(
            num_scalar_prefetch=0,
            grid=(n // bn, n_hw),
            in_specs=[
                # If a profile shows exposed DMA, bump the logits spec to
                # pipeline_mode=pl.Buffered(3) -- but not on v7x with big tiles.
                pl.BlockSpec((bn, c, t), lambda i, j: (i, 0, j)),   # logits tile
                pl.BlockSpec((bn, 1, t), lambda i, j: (i, 0, j)),   # int8 targets
            ],
            out_specs=out_specs,
        ),
        compiler_params=pltpu.CompilerParams(
            dimension_semantics=("parallel", "arbitrary"),           # batch ||, HW reduce
            vmem_limit_bytes=vmem_limit),
    )(logits, tgt)

    outs = list(outs) if isinstance(outs, (list, tuple)) else [outs]
    inter = union = nll = None
    if compute_dice:
        inter, union = outs[0][:, :, 0], outs[1][:, :, 0]
        outs = outs[2:]
    if compute_ce:
        nll = outs[0]
    return inter, union, nll


def _finish_dice(inter, union, weights, epsilon):
    dice = 2.0 * (inter + epsilon) / (union + epsilon)
    if weights is not None:
        wvec = jnp.asarray(weights, jnp.float32)
        assert wvec.shape == (inter.shape[1],), \
            "Length of weight tensor must match the number of classes"
        dice = dice * wvec                                   # class weights outside kernel
    return 1.0 - jnp.mean(dice)


def dice_loss(output, target, weights=None, epsilon=1e-6, *,
              batch_tile=None, hw_tile=None):
    """Pallas DiceLoss: output (N,C,H,W) logits, target (N,H,W) int classes."""
    inter, union, _ = _partial_sums(output, target, compute_dice=True,
                                    compute_ce=False,
                                    batch_tile=batch_tile, hw_tile=hw_tile)
    return _finish_dice(inter, union, weights, epsilon)


def cross_entropy_loss(output, target, *, batch_tile=None, hw_tile=None):
    """Pallas pixel-wise softmax cross-entropy (mean over all pixels)."""
    n, _, h, w = output.shape
    _, _, nll = _partial_sums(output, target, compute_dice=False,
                              compute_ce=True,
                              batch_tile=batch_tile, hw_tile=hw_tile)
    return jnp.sum(nll) / (n * h * w)


def combo_dice_ce_loss(output, target, dice_weight, ce_weight, *,
                       dice_class_weights=None, epsilon=1e-6,
                       batch_tile=None, hw_tile=None):
    """Fused Dice + CE: one softmax / one logits streaming pass."""
    n, _, h, w = output.shape
    inter, union, nll = _partial_sums(output, target, compute_dice=True,
                                      compute_ce=True,
                                      batch_tile=batch_tile, hw_tile=hw_tile)
    dice = _finish_dice(inter, union, dice_class_weights, epsilon)
    ce = jnp.sum(nll) / (n * h * w)
    return dice_weight * dice + ce_weight * ce


class ComboLoss:
    """JAX mirror of the PyTorch ComboLoss module (sum of weighted losses)."""

    def __init__(self, losses, weights):
        assert len(weights) == len(losses), \
            'Length of weight array must match the number of loss functions'
        self.losses = list(losses)
        self.weights = list(weights)

    def __call__(self, output, target):
        # Fast path: Dice + CE share one fused Pallas pass over the logits.
        if (len(self.losses) == 2
                and dice_loss in self.losses
                and cross_entropy_loss in self.losses):
            di = self.losses.index(dice_loss)
            ci = self.losses.index(cross_entropy_loss)
            return combo_dice_ce_loss(output, target,
                                      dice_weight=self.weights[di],
                                      ce_weight=self.weights[ci])
        return sum(loss(output, target) * wt
                   for loss, wt in zip(self.losses, self.weights))


# ----------------------------------------------------------------------------
# Pure-JAX references
# ----------------------------------------------------------------------------
def dice_loss_ref(output, target, weights=None, epsilon=1e-6):
    c = output.shape[1]
    logits = output.astype(jnp.float32)
    onehot = jax.nn.one_hot(target, c, dtype=jnp.float32).transpose(0, 3, 1, 2)
    p = jax.nn.softmax(logits, axis=1)
    inter = jnp.sum(p * onehot, axis=(2, 3))
    union = jnp.sum(p + onehot, axis=(2, 3))
    dice = 2.0 * (inter + epsilon) / (union + epsilon)
    if weights is not None:
        dice = dice * jnp.asarray(weights, dice.dtype)
    return 1.0 - jnp.mean(dice)


def cross_entropy_ref(output, target):
    logits = output.astype(jnp.float32)
    logp = jax.nn.log_softmax(logits, axis=1)
    nll = -jnp.take_along_axis(logp, target[:, None, :, :], axis=1)
    return jnp.mean(nll)


# ----------------------------------------------------------------------------
# Demo / checks
# ----------------------------------------------------------------------------
if __name__ == "__main__":
    key = jax.random.PRNGKey(0)
    k1, k2, k3, k4 = jax.random.split(key, 4)

    def check(name, got, want, tol):
        got = float(jax.block_until_ready(got))
        want = float(want)
        assert abs(got - want) <= tol * (1.0 + abs(want)), (name, got, want)

    # Case 1: NCHW logits like the PyTorch module (batch=2, classes=4, 16x16).
    N, C, H, W = 2, 4, 16, 16
    logits = jax.random.normal(k1, (N, C, H, W), jnp.float32)
    target = jax.random.randint(k2, (N, H, W), 0, C, jnp.int32)
    class_w = jnp.array([0.5, 1.0, 1.5, 2.0], jnp.float32)

    check("dice", dice_loss(logits, target), dice_loss_ref(logits, target), 2e-3)
    check("dice_weighted", dice_loss(logits, target, weights=class_w),
          dice_loss_ref(logits, target, weights=class_w), 2e-3)
    # Exercise spatial tiling + multi-row batch blocks + resident accumulation.
    check("dice_tiled", dice_loss(logits, target, hw_tile=128, batch_tile=2),
          dice_loss_ref(logits, target), 2e-3)
    # bf16 logits: DMA'd in native dtype, cast to f32 inside the kernel.
    logits_bf16 = logits.astype(jnp.bfloat16)
    check("dice_bf16", dice_loss(logits_bf16, target),
          dice_loss_ref(logits_bf16, target), 2e-3)
    check("ce", cross_entropy_loss(logits, target),
          cross_entropy_ref(logits, target), 2e-3)

    # Case 2: shapes that don't divide the tiles (masked tail, C not multiple of 8).
    N2, C2, H2, W2 = 2, 5, 15, 20
    logits2 = jax.random.normal(k3, (N2, C2, H2, W2), jnp.float32)
    target2 = jax.random.randint(k4, (N2, H2, W2), 0, C2, jnp.int32)
    check("dice_masked_tail", dice_loss(logits2, target2, hw_tile=128),
          dice_loss_ref(logits2, target2), 2e-3)
    check("ce_masked_tail", cross_entropy_loss(logits2, target2, hw_tile=128),
          cross_entropy_ref(logits2, target2), 2e-3)

    # ComboLoss forward: fused Dice+CE Pallas pass.
    combo = ComboLoss([dice_loss, cross_entropy_loss], [0.7, 0.3])
    combo_ref = (0.7 * dice_loss_ref(logits, target)
                 + 0.3 * cross_entropy_ref(logits, target))
    check("combo_fused", combo(logits, target), combo_ref, 2e-3)

    # Fused path with masked tail tiles.
    combo_ref2 = (0.7 * dice_loss_ref(logits2, target2)
                  + 0.3 * cross_entropy_ref(logits2, target2))
    check("combo_fused_masked",
          combo_dice_ce_loss(logits2, target2, 0.7, 0.3, hw_tile=128),
          combo_ref2, 2e-3)

    print("KERNEL_OK")
</pallas_src>

<mosaic_0001>
module attributes {stable_mosaic.version = 11 : i64} {
  func.func @_partials_kernel(%arg0: i32, %arg1: i32, %arg2: memref<1x4x256xf32, #tpu.memory_space<vmem>>, %arg3: memref<1x1x256xi8, #tpu.memory_space<vmem>>, %arg4: memref<1x4x1xf32, #tpu.memory_space<vmem>>, %arg5: memref<1x4x1xf32, #tpu.memory_space<vmem>>) attributes {dimension_semantics = [#tpu.dimension_semantics<parallel>, #tpu.dimension_semantics<arbitrary>], iteration_bounds = array<i64: 2, 1>, scalar_prefetch = 0 : i64, scratch_operands = 0 : i64, tpu.core_type = #tpu.core_type<tc>, window_params = [{transform_indices = @transform_0, window_bounds = array<i64: 1, 4, 256>}, {transform_indices = @transform_1, window_bounds = array<i64: 1, 1, 256>}, {transform_indices = @transform_2, window_bounds = array<i64: 1, 4, 1>}, {transform_indices = @transform_3, window_bounds = array<i64: 1, 4, 1>}]} {
    %c0_i32 = arith.constant 0 : i32
    %0 = arith.cmpi eq, %arg1, %c0_i32 : i32
    %1 = arith.extui %0 : i1 to i32
    %c0_i32_0 = arith.constant 0 : i32
    %2 = arith.cmpi ne, %1, %c0_i32_0 : i32
    scf.if %2 {
      %cst_23 = arith.constant 0.000000e+00 : f32
      %34 = vector.broadcast %cst_23 : f32 to vector<1x4x1xf32>
      %c0_24 = arith.constant 0 : index
      %c0_25 = arith.constant 0 : index
      %c0_26 = arith.constant 0 : index
      %35 = vector.load %arg4[%c0_24, %c0_25, %c0_26] : memref<1x4x1xf32, #tpu.memory_space<vmem>>, vector<1x4x1xf32>
      tpu.vector_store %arg4[%c0_24, %c0_25, %c0_26], %34 {strides = array<i32>} : memref<1x4x1xf32, #tpu.memory_space<vmem>>, vector<1x4x1xf32>,
      %cst_27 = arith.constant 0.000000e+00 : f32
      %36 = vector.broadcast %cst_27 : f32 to vector<1x4x1xf32>
      %c0_28 = arith.constant 0 : index
      %c0_29 = arith.constant 0 : index
      %c0_30 = arith.constant 0 : index
      %37 = vector.load %arg5[%c0_28, %c0_29, %c0_30] : memref<1x4x1xf32, #tpu.memory_space<vmem>>, vector<1x4x1xf32>
      tpu.vector_store %arg5[%c0_28, %c0_29, %c0_30], %36 {strides = array<i32>} : memref<1x4x1xf32, #tpu.memory_space<vmem>>, vector<1x4x1xf32>,
    } else {
    }
    %c0 = arith.constant 0 : index
    %c0_1 = arith.constant 0 : index
    %c0_2 = arith.constant 0 : index
    %3 = vector.load %arg2[%c0, %c0_1, %c0_2] : memref<1x4x256xf32, #tpu.memory_space<vmem>>, vector<1x4x256xf32>
    %cst = arith.constant dense<0xFF800000> : vector<1x256xf32>
    %4 = vector.multi_reduction <maximumf>, %3, %cst [1] : vector<1x4x256xf32> to vector<1x256xf32>
    %5 = vector.shape_cast %4 : vector<1x256xf32> to vector<1x1x256xf32>
    %6 = vector.broadcast %5 : vector<1x1x256xf32> to vector<1x4x256xf32>
    %7 = arith.subf %3, %6 : vector<1x4x256xf32>
    %8 = math.exp %7 : vector<1x4x256xf32>
    %cst_3 = arith.constant dense<0.000000e+00> : vector<1x256xf32>
    %9 = vector.multi_reduction <add>, %8, %cst_3 [1] : vector<1x4x256xf32> to vector<1x256xf32>
    %10 = vector.shape_cast %9 : vector<1x256xf32> to vector<1x1x256xf32>
    %c0_4 = arith.constant 0 : index
    %c0_5 = arith.constant 0 : index
    %c0_6 = arith.constant 0 : index
    %11 = vector.load %arg3[%c0_4, %c0_5, %c0_6] : memref<1x1x256xi8, #tpu.memory_space<vmem>>, vector<1x1x256xi8>
    %12 = arith.extsi %11 : vector<1x1x256xi8> to vector<1x1x256xi32>
    %13 = tpu.iota {dimensions = array<i32: 1>} : vector<1x4x256xi32>
    %14 = vector.broadcast %12 : vector<1x1x256xi32> to vector<1x4x256xi32>
    %15 = arith.cmpi eq, %14, %13 : vector<1x4x256xi32>
    %16 = tpu.reciprocal %10 : vector<1x1x256xf32> -> vector<1x1x256xf32>
    %17 = vector.broadcast %16 : vector<1x1x256xf32> to vector<1x4x256xf32>
    %18 = arith.mulf %8, %17 : vector<1x4x256xf32>
    %cst_7 = arith.constant 1.000000e+00 : f32
    %cst_8 = arith.constant 0.000000e+00 : f32
    %19 = vector.broadcast %cst_7 : f32 to vector<1x4x256xf32>
    %20 = vector.broadcast %cst_8 : f32 to vector<1x4x256xf32>
    %21 = arith.select %15, %19, %20 : vector<1x4x256xi1>, vector<1x4x256xf32>
    %c0_9 = arith.constant 0 : index
    %c0_10 = arith.constant 0 : index
    %c0_11 = arith.constant 0 : index
    %22 = vector.load %arg4[%c0_9, %c0_10, %c0_11] : memref<1x4x1xf32, #tpu.memory_space<vmem>>, vector<1x4x1xf32>
    %23 = arith.mulf %18, %21 : vector<1x4x256xf32>
    %cst_12 = arith.constant dense<0.000000e+00> : vector<1x4xf32>
    %24 = vector.multi_reduction <add>, %23, %cst_12 [2] : vector<1x4x256xf32> to vector<1x4xf32>
    %25 = vector.shape_cast %24 : vector<1x4xf32> to vector<1x4x1xf32>
    %26 = arith.addf %22, %25 : vector<1x4x1xf32>
    %c0_13 = arith.constant 0 : index
    %c0_14 = arith.constant 0 : index
    %c0_15 = arith.constant 0 : index
    %27 = vector.load %arg4[%c0_13, %c0_14, %c0_15] : memref<1x4x1xf32, #tpu.memory_space<vmem>>, vector<1x4x1xf32>
    tpu.vector_store %arg4[%c0_13, %c0_14, %c0_15], %26 {strides = array<i32>} : memref<1x4x1xf32, #tpu.memory_space<vmem>>, vector<1x4x1xf32>,
    %c0_16 = arith.constant 0 : index
    %c0_17 = arith.constant 0 : index
    %c0_18 = arith.constant 0 : index
    %28 = vector.load %arg5[%c0_16, %c0_17, %c0_18] : memref<1x4x1xf32, #tpu.memory_space<vmem>>, vector<1x4x1xf32>
    %29 = arith.addf %18, %21 : vector<1x4x256xf32>
    %cst_19 = arith.constant dense<0.000000e+00> : vector<1x4xf32>
    %30 = vector.multi_reduction <add>, %29, %cst_19 [2] : vector<1x4x256xf32> to vector<1x4xf32>
    %31 = vector.shape_cast %30 : vector<1x4xf32> to vector<1x4x1xf32>
    %32 = arith.addf %28, %31 : vector<1x4x1xf32>
    %c0_20 = arith.constant 0 : index
    %c0_21 = arith.constant 0 : index
    %c0_22 = arith.constant 0 : index
    %33 = vector.load %arg5[%c0_20, %c0_21, %c0_22] : memref<1x4x1xf32, #tpu.memory_space<vmem>>, vector<1x4x1xf32>
    tpu.vector_store %arg5[%c0_20, %c0_21, %c0_22], %32 {strides = array<i32>} : memref<1x4x1xf32, #tpu.memory_space<vmem>>, vector<1x4x1xf32>,
    return
  }
  func.func @transform_0(%arg0: i32, %arg1: i32) -> (i32, i32, i32) {
    %c0_i32 = arith.constant 0 : i32
    %c0_i32_0 = arith.constant 0 : i32
    return %arg0, %c0_i32, %arg1 : i32, i32, i32
  }
  func.func @transform_1(%arg0: i32, %arg1: i32) -> (i32, i32, i32) {
    %c0_i32 = arith.constant 0 : i32
    %c0_i32_0 = arith.constant 0 : i32
    return %arg0, %c0_i32, %arg1 : i32, i32, i32
  }
  func.func @transform_2(%arg0: i32, %arg1: i32) -> (i32, i32, i32) {
    %c0_i32 = arith.constant 0 : i32
    %c0_i32_0 = arith.constant 0 : i32
    %c0_i32_1 = arith.constant 0 : i32
    return %arg0, %c0_i32, %c0_i32_0 : i32, i32, i32
  }
  func.func @transform_3(%arg0: i32, %arg1: i32) -> (i32, i32, i32) {
    %c0_i32 = arith.constant 0 : i32
    %c0_i32_0 = arith.constant 0 : i32
    %c0_i32_1 = arith.constant 0 : i32
    return %arg0, %c0_i32, %c0_i32_0 : i32, i32, i32
  }
}

</mosaic_0001>

<bundles_post_ra>
// kernel: tpu_custom_call.1
= control target key start
LH: loop header
LB: loop body
LE: loop exit
PB: predicated region body
PF: predicated region fallthrough
CT: control target
= control target key end

     0   :  { %9 = vsyncpa [#allocation3], 0  ;;  %s822_s0 = inlined_call_operand.hbm [shape: f32[2,4,256], index: 0, kind: input, shape index: {}]   ;;  %s823_s1 = inlined_call_operand.vmem [shape: s8[2,1,256], index: 1, kind: input, shape index: {}]   ;;  %s824_s2 = inlined_call_operand.vmem [shape: f32[2,4,1], index: 2, kind: output, shape index: {0}]   ;;  %s825_s3 = inlined_call_operand.vmem [shape: f32[2,4,1], index: 3, kind: output, shape index: {1}]  }
   0x1   :  { %11 = vsyncpa [#allocation3 + $0x1], 0  ;;  %s662_s12 = smov 0   ;;  %s664_s13 = smov 0  }
   0x2   :  { %s666_s14 = smov 0   ;;  %s668_s15 = smov 0  }
   0x3   :  { %s670_s16 = smov 0   ;;  %s672_s17 = smov 0  }
   0x4 LB: > { %s480_s18 = sadd.s32 4294967295, %s638_s17   ;;  %s29_s19 = sadd.s32 1, %s634_s16  ;;  %s638_s17 = sphi %s672_s17, %s17_s17   ;;  %s634_s16 = sphi %s670_s16, %s835_s16   ;;  %s630_s15 = sphi %s668_s15, %s834_s15   ;;  %s626_s14 = sphi %s666_s14, %s833_s14   ;;  %s622_s13 = sphi %s664_s13, %s832_s13   ;;  %s618_s12 = sphi %s662_s12, %s831_s12  }
   0x5   : > { %p31_p0 = scmp.ge.s32.totalorder %s29_s19, 2  ;;  %s38_s20 = sadd.s32 1, %s626_s14 }
   0x6   : > { %p45_p1 = scmp.ne.s32.totalorder %s626_s14, %s622_s13  ;;  %p46_p2 = scmp.eq.s32.totalorder %s638_s17, 0 }
   0x7   : > { %s837_s19 = smov (%p31_p0, %s29_s19), 0  ;;  %p51_p4 = scmp.ne.s32.totalorder %s622_s13, %s618_s12 }
   0x8   : > { %p698_p3 = por %p46_p2, %p45_p1  ;;  %s33_s22 = ssub.s32 %s634_s16, %s837_s19 }
   0x9   : > { %p52_p5 = scmp.eq.s32.totalorder %s480_s18, 0  ;;  %p36_p6 = scmp.eq.s32.totalorder %s33_s22, 0 }
   0xa   : > { %p501_p8 = scmp.lt.s32.totalorder %s638_s17, 2  ;;  %s155_s25 = sand.u32 1, %s626_s14  }
   0xb   : > { %p705_p7 = por %p52_p5, %p51_p4  ;;  %s494_s26 = sshll.u32 %s634_s16, 7 }
   0xc   : > { %s711_s24 = scalar_select %p36_p6, %s626_s14, %s38_s20  }
   0xd   : > { %s484_s27 = sshll.u32 %s155_s25, 3  ;;  %s718_s30 = scalar_lea.hbm %s822_s0, %s494_s26 }
   0xe   : > { %s159_s4 = scalar_lea.vmem [#allocation2], %s484_s27  ;;  %p722_p9 = pnand %p501_p8, %p698_p3 }
   0xf   : > { %s169_s5 = sshll.u32 %s159_s4, 4  ;;  %s156_s7 = scalar_lea.sflag [#allocation3], %s155_s25  ;;  %s726_s5 = int_to_ptr.vmem [resolvable:$true] %s169_s5 }
  0x10   : > { %s558_s8 = scalar_lea.hbm %s718_s30, 128  ;;  %p560_p13 = pneg %p722_p9 }
  0x11   : > { %p559_p12 = scmp.ne.s32.totalorder %s718_s30, %s558_s8  ;;  %s563_s11 = scalar_lea.hbm %s822_s0, 256 }
  0x12   : > { %p564_p2 = scmp.lt.u32.totalorder %s718_s30, %s822_s0  ;;  %p565_p3 = scmp.lt.u32.totalorder %s563_s11, %s558_s8 }
  0x13   : > { %p561_p0 = pnand %p560_p13, %p559_p12  ;;  %p567_p5 = scmp.lt.u32.totalorder %s558_s8, %s718_s30 }
  0x14   : > { %p566_p4 = por %p565_p3, %p564_p2 }
  0x15   : > { %p562_p1 = pneg %p561_p0 }
  0x16   : > { %p568_p6 = por %p567_p5, %p566_p4 }
  0x18   : > { %p569_p8 = pnand %p568_p6, %p562_p1 }
  0x1a   : > { %572 = shalt.err (!%p569_p8)
}
  0x1b   : > { %s573_s20 = scalar_lea.vmem %s726_s5, 128  ;;  %s640_s21 = smov [#allocation2]  }
  0x1c   : > { %p574_p12 = scmp.ne.s32.totalorder %s726_s5, %s573_s20  ;;  %s578_s22 = sshll.u32 %s640_s21, 4  ;;  %s579_s22 = int_to_ptr.vmem [resolvable:$false] %s578_s22 }
  0x1d   : > { %s580_s25 = scalar_lea.vmem %s579_s22, 256  ;;  %p581_p11 = scmp.lt.s32.totalorder %s726_s5, %s579_s22 }
  0x1e   : > { %p576_p0 = pnand %p574_p12, %p560_p13  ;;  %p582_p2 = scmp.lt.s32.totalorder %s580_s25, %s573_s20 }
  0x20   : > { %p577_p10 = pneg %p576_p0  ;;  %p583_p3 = por %p582_p2, %p581_p11 }
  0x22   : > { %p584_p4 = pnand %p583_p3, %p577_p10 }
  0x24   : > { %587 = shalt.err (!%p584_p4)
}
  0x25   : > { %500 = dma.hbm_to_vmem [thread:$0]  (!%p722_p9), %s718_s30, 128, %s726_s5, %s156_s7  }
  0x26   : > { %p829_p1 = scmp.lt.s32.totalorder %s638_s17, 3  ;;  %p830_p5 = scmp.ge.s32.totalorder %s638_s17, 1 }
  0x28   : > { %p187_p13 = pnand %p830_p5, %p829_p1 }
  0x29   : > { %s192_s26 = sand.u32 (!%p187_p13), 1, %s622_s13  }
  0x2a   : > { %190 = sbr.rel (%p187_p13) target bundleno = 269 (0x10d), region = 28  ;;  %s488_s27 = sshll.u32 (!%p187_p13), %s192_s26, 3 }
  0x2b   : > { %s193_s28 = scalar_lea.sflag (!%p187_p13), [#allocation3], %s192_s26  ;;  %s196_s29 = scalar_lea.vmem (!%p187_p13), [#allocation2], %s488_s27 }
  0x31   : > { %613 = dma.done.wait (%p705_p7), %s193_s28, 128  }
  0x32   : > { %615 = vsyncadd (%p705_p7), %s193_s28, 4294967168  ;;  %p232_p10 = scmp.lt.s32.totalorder %s630_s15, 1  ;;  %vm252_vm0 = vcmask 3072   ;;  %vm259_vm1 = vcmask 1043456   ;;  %v641_v0 = vmov 0.0   ;;  %v255_v1 = vld [vmem:[%s196_s29] sm:$0xff]  ;;  %v300_v23 = vlaneseq }
  0x33   : > { %v257_v2 = vcombine.high %v255_v1, %v255_v1  ;;  %v260_v3 = vsel %vm259_vm1, %v255_v1, -inf }
  0x34   : > { %s839_s15 = smov (!%p232_p10, %s630_s15), 1  ;;  %v261_v4 = vrot.slane %v260_v3, 4  ;;  %v301_v28 = vshrl.u32 %v300_v23, 7 }
  0x35   : > { %s490_s30 = sshll.u32 %s839_s15, 2  ;;  %v267_v5 = vsel %vm259_vm1, %v257_v2, -inf  ;;  %s489_s23 = sshll.u32 %s839_s15, 1 }
  0x36   : > { %s774_s6 = scalar_lea.vmem %s824_s2, %s490_s30  ;;  %v262_v6 = vmax.f32 %v260_v3, %v261_v4  ;;  %v268_v7 = vrot.slane %v267_v5, 4  ;;  %s238_s9 = scalar_lea.vmem %s823_s1, %s489_s23  ;;  %v304_v35 = vsub.s32 0, %v301_v28  ;;  %v308_v36 = vsub.s32 4, %v301_v28 }
  0x37   : > { %253 = vst.msk [vmem:[%s774_s6] sm:$0xf] %vm252_vm0, %v641_v0  ;;  %v298_v31 = vld [vmem:[%s238_s9] sm:$0x3]  ;;  %s247_s12 = scalar_lea.vmem %s825_s3, %s490_s30 }
  0x38   : > { %v263_v8 = vrot.slane %v262_v6, 2  ;;  %v269_v9 = vmax.f32 %v267_v5, %v268_v7  ;;  %v299_v34 = vunpack.c.0.s8 %v298_v31  ;;  %254 = vst.msk [vmem:[%s247_s12] sm:$0xf] %vm252_vm0, %v641_v0 }
  0x3a   : > { %v264_v10 = vmax.f32 %v262_v6, %v263_v8  ;;  %v270_v11 = vrot.slane %v269_v9, 2  ;;  %v305_v41 = vrot.slane %v299_v34, %v304_v35  ;;  %v309_v42 = vrot.slane %v299_v34, %v308_v36 }
  0x3c   : > { %v265_v12 = vrot.slane %v264_v10, 1  ;;  %v271_v13 = vmax.f32 %v269_v9, %v270_v11  ;;  %v313_v44 = vrot.slane %v305_v41, %v304_v35  ;;  %v317_v45 = vrot.slane %v309_v42, %v304_v35 }
  0x3e   : > { %v266_v14 = vmax.f32 %v264_v10, %v265_v12  ;;  %v272_v15 = vrot.slane %v271_v13, 1  ;;  %vm318_vm2 = vcmp.eq.s32.totalorder %v313_v44, %v301_v28  ;;  %vm319_vm3 = vcmp.eq.s32.totalorder %v317_v45, %v301_v28  ;;  %v329_v63 = vld [vmem:[%s774_s6] sm:$0xf] }
  0x3f   : > { %v327_v47 = vsel %vm318_vm2, 1.0, %v641_v0  ;;  %v328_v48 = vsel %vm319_vm3, 1.0, %v641_v0  ;;  %v346_v3 = vld [vmem:[%s247_s12] sm:$0xf] }
  0x40   : > { %v273_v16 = vmax.f32 %v271_v13, %v272_v15  ;;  %v332_v51 = vcombine.low %v327_v47, %v328_v48 }
  0x42   : > { %v276_v17 = vcombine.low %v266_v14, %v273_v16 }
  0x44   : > { %v278_v18 = vsub.f32 %v255_v1, %v276_v17 }
  0x46   : > { %v279_v19 = vmul.f32 1.442695, %v278_v18 }
  0x48   : > { %552 = vpow2.f32 %v279_v19 }
  0x52   : > { %v553_v20 = vpop.eup %552 }
  0x53   : > { %v282_v21 = vcombine.high %v553_v20, %v553_v20  ;;  %v284_v22 = vsel %vm259_vm1, %v553_v20, 0.0 }
  0x54   : > { %v285_v24 = vrot.slane %v284_v22, 4 }
  0x55   : > { %v291_v25 = vsel %vm259_vm1, %v282_v21, 0.0 }
  0x56   : > { %v286_v26 = vadd.f32 %v285_v24, %v284_v22  ;;  %v292_v27 = vrot.slane %v291_v25, 4 }
  0x58   : > { %v287_v29 = vrot.slane %v286_v26, 2  ;;  %v293_v30 = vadd.f32 %v292_v27, %v291_v25 }
  0x5a   : > { %v288_v32 = vadd.f32 %v287_v29, %v286_v26  ;;  %v294_v33 = vrot.slane %v293_v30, 2 }
  0x5c   : > { %v289_v37 = vrot.slane %v288_v32, 1  ;;  %v295_v38 = vadd.f32 %v294_v33, %v293_v30 }
  0x5e   : > { %v290_v39 = vadd.f32 %v289_v37, %v288_v32  ;;  %v296_v40 = vrot.slane %v295_v38, 1 }
  0x60   : > { %v297_v43 = vadd.f32 %v296_v40, %v295_v38  ;;  %554 = vrcp.f32 %v290_v39 }
  0x62   : > { %556 = vrcp.f32 %v297_v43 }
  0x6a   : > { %v555_v46 = vpop.eup %554 }
  0x6c   : > { %v557_v49 = vpop.eup %556 }
  0x6d   : > { %v324_v50 = vcombine.low %v555_v46, %v557_v49 }
  0x6f   : > { %v326_v52 = vmul.f32 %v553_v20, %v324_v50 }
  0x71   : > { %v334_v53 = vmul.f32 %v332_v51, %v326_v52  ;;  %v347_v54 = vadd.f32 %v332_v51, %v326_v52 }
  0x73   : > { %v336_v55 = vcombine.high %v334_v53, %v334_v53  ;;  %v338_v56 = vsel %vm259_vm1, %v334_v53, 0.0  ;;  %v349_v57 = vcombine.high %v347_v54, %v347_v54  ;;  %v351_v59 = vsel %vm259_vm1, %v347_v54, 0.0 }
  0x75   : > { %v339_v58 = vsel %vm259_vm1, %v336_v55, 0.0  ;;  %v352_v60 = vsel %vm259_vm1, %v349_v57, 0.0 }
  0x76   : > { %v340_v61 = vadd.f32 %v339_v58, %v338_v56  ;;  %v353_v62 = vadd.f32 %v352_v60, %v351_v59 }
  0x78   : > { %341 = vadd.xlane.f32.xlu0 %v340_v61 }
  0x7c   : > { %354 = vadd.xlane.f32.xlu0 %v353_v62 }
 0x105   : > { %v342_v1 = vpop.xlane.xlu0 %341 }
 0x106   : > { %v343_v2 = vadd.f32 %v342_v1, %v329_v63 }
 0x108   : > { %345 = vst.msk [vmem:[%s774_s6] sm:$0xf] %vm252_vm0, %v343_v2 }
 0x109   : > { %v355_v4 = vpop.xlane.xlu0 %354 }
 0x10a   : > { %v356_v5 = vadd.f32 %v355_v4, %v346_v3 }
 0x10c   : > { %357 = vst.msk [vmem:[%s247_s12] sm:$0xf] %vm252_vm0, %v356_v5 }
 0x10d PF: > { %s17_s17 = sadd.s32 1, %s638_s17   ;;  %s831_s12 = smov %s622_s13 }
 0x10e   : > { %p14_p7 = scmp.ge.s32.totalorder %s17_s17, 4   ;;  %s832_s13 = smov %s626_s14 }
 0x10f   : > { %s833_s14 = smov %s711_s24  ;;  %s834_s15 = smov %s634_s16 }
 0x110   : > { %s835_s16 = smov %s837_s19  ;;  %16 = sbr.rel (!%p14_p7) target bundleno = 4 (0x4), region = 87 }
 0x117   :  { %391 = vsyncpa [#allocation3], 1 }
 0x118   :  { %393 = vsyncpa [#allocation3 + $0x1], 1 }

</bundles_post_ra>
